<compile_context>
chip_gen: v7x
topology: tpu7x:2x2x1
jax: 0.10.0
libtpu: 0.0.40
codegen_flags: <defaults>
</compile_context>

<pallas_src>
import functools

import jax
import jax.numpy as jnp
from jax.experimental import pallas as pl
from jax.experimental.pallas import tpu as pltpu


def _supcon_kernel(x_ref, loss_ref, gram_ref, xs_ref, *,
                   bsz, hw, channels_per_block, temperature, base_temperature):
    """Grid axis 0 walks channel blocks of the stacked features.

    x_ref:    [N, channels_per_block*HW]  raw features for this channel block
    loss_ref: [1, 1]                      scalar loss (written at last step)
    gram_ref: [N, N]   VMEM scratch       running normalized gram accumulator
    xs_ref:   [N, channels_per_block*HW]  VMEM scratch, per-channel normalized
    """
    n = x_ref.shape[0]
    k = pl.program_id(0)

    @pl.when(k == 0)
    def _init():
        gram_ref[...] = jnp.zeros_like(gram_ref)

    # Per-channel L2 normalization: rsqrt on the EUP + one VPU multiply per
    # slab (no divide pass). channels_per_block is small & static, so a Python
    # unroll is fine (switch to lax.fori_loop if it ever grows large).
    for i in range(channels_per_block):
        xc = x_ref[:, i * hw:(i + 1) * hw]                            # [N, HW]
        inv = jax.lax.rsqrt(jnp.sum(xc * xc, axis=1, keepdims=True))  # [N, 1]
        xs_ref[:, i * hw:(i + 1) * hw] = xc * inv   # 128-lane-aligned store

    # One long-K MXU matmul per grid step (K = channels_per_block*HW), f32 acc.
    xs = xs_ref[...]
    gram_ref[...] += jax.lax.dot_general(
        xs, xs, (((1,), (1,)), ((), ())),           # xs @ xs.T
        preferred_element_type=jnp.float32)

    @pl.when(k == pl.num_programs(0) - 1)
    def _epilogue():
        anchor_dot_contrast = gram_ref[...] * (1.0 / temperature)     # [N, N]

        # Masks built in-kernel: rows [0, 2*bsz) are class 0 (prediction + GT),
        # rows [2*bsz, 3*bsz) are class 1 (with_rain); diagonal dropped.
        row_ids = jax.lax.broadcasted_iota(jnp.int32, (n, n), 0)
        col_ids = jax.lax.broadcasted_iota(jnp.int32, (n, n), 1)
        same_class = (row_ids >= 2 * bsz) == (col_ids >= 2 * bsz)
        off_diag = row_ids != col_ids
        logits_mask = off_diag.astype(jnp.float32)
        mask = (same_class & off_diag).astype(jnp.float32)

        # Numerically-stable log-softmax style computation (matches torch code).
        logits_max = jnp.max(anchor_dot_contrast, axis=1, keepdims=True)
        logits = anchor_dot_contrast - logits_max
        exp_logits = jnp.exp(logits) * logits_mask
        log_prob = logits - jnp.log(
            jnp.sum(exp_logits, axis=1, keepdims=True) + 0.0001)

        pos_sum = jnp.sum(mask * log_prob, axis=1, keepdims=True)     # [N, 1]
        pos_cnt = jnp.sum(mask, axis=1, keepdims=True) + 0.0001       # [N, 1]
        # pl.reciprocal keeps the divide off the VALU path; approx=False so the
        # once-per-kernel [N,1] epilogue stays within the 1e-4 check tolerance.
        mean_log_prob_pos = pos_sum * pl.reciprocal(pos_cnt, approx=False)
        loss_vec = -(temperature / base_temperature) * mean_log_prob_pos

        loss_ref[...] = jnp.sum(loss_vec, axis=0, keepdims=True) * (1.0 / n)


def _pick_block_channels(num_channels, hw, target_cols=512):
    """Largest channel count per contraction block whose column width is
    lane-aligned (multiple of 128) and <= target_cols; falls back to the full
    channel dim (always legal: block equals the full array extent)."""
    best = None
    for d in range(1, num_channels + 1):
        if num_channels % d:
            continue
        cols = d * hw
        if cols % 128 != 0:
            continue
        if cols <= target_cols:
            best = d
    return best if best is not None else num_channels


def supcon_loss(features, labels, with_rain,
                temperature=0.07, base_temperature=0.07, block_channels=None):
    """JAX/Pallas equivalent of SupConLoss.forward(features, labels, with_rain)."""
    bsz, C, H, W = features.shape
    assert labels.shape == features.shape and with_rain.shape == features.shape
    hw = H * W
    n = 3 * bsz

    # Stack [features, labels, with_rain] along batch as [N, C*HW].  A single
    # cheap concat of contiguous reshapes -- no transpose (the previous
    # version's channel-major transpose was an extra full HBM read+write).
    x = jnp.concatenate(
        [features.reshape(bsz, C * hw).astype(jnp.float32),
         labels.reshape(bsz, C * hw).astype(jnp.float32),
         with_rain.reshape(bsz, C * hw).astype(jnp.float32)], axis=0)

    if block_channels is None:
        block_channels = _pick_block_channels(C, hw)
    assert C % block_channels == 0
    block_cols = block_channels * hw
    assert block_cols % 128 == 0 or block_cols == C * hw, (
        "channel-block width must be lane aligned or cover the full extent")
    num_blocks = C // block_channels

    kernel = functools.partial(
        _supcon_kernel, bsz=bsz, hw=hw, channels_per_block=block_channels,
        temperature=float(temperature),
        base_temperature=float(base_temperature))

    out = pl.pallas_call(
        kernel,
        out_shape=jax.ShapeDtypeStruct((1, 1), jnp.float32),
        grid_spec=pltpu.PrefetchScalarGridSpec(
            num_scalar_prefetch=0,
            grid=(num_blocks,),
            in_specs=[pl.BlockSpec((n, block_cols), lambda k: (0, k))],
            out_specs=pl.BlockSpec((1, 1), lambda k: (0, 0)),
            scratch_shapes=[pltpu.VMEM((n, n), jnp.float32),
                            pltpu.VMEM((n, block_cols), jnp.float32)]),
        compiler_params=pltpu.CompilerParams(
            dimension_semantics=("arbitrary",),
            vmem_limit_bytes=32 * 1024 * 1024),
    )(x)
    return out[0, 0]


def _supcon_ref(features, labels, with_rain,
                temperature=0.07, base_temperature=0.07):
    """Pure-JAX transcription of the PyTorch forward (for verification)."""
    bsz = features.shape[0]
    f = jnp.concatenate([features[:, None], labels[:, None], with_rain[:, None]],
                        axis=0)                                    # [3b,1,C,H,W]
    y = jnp.concatenate([jnp.zeros(bsz), jnp.zeros(bsz), jnp.ones(bsz)])
    nrm = jnp.sqrt(jnp.sum(f * f, axis=(3, 4), keepdims=True))
    f = f / nrm
    N = f.shape[0]
    f = f.reshape(N, 1, -1)
    mask = (y[:, None] == y[None, :]).astype(jnp.float32)
    cf = f[:, 0]
    adc = (cf @ cf.T) / temperature
    logits = adc - jnp.max(adc, axis=1, keepdims=True)
    logits_mask = 1.0 - jnp.eye(N, dtype=jnp.float32)
    mask = mask * logits_mask
    exp_logits = jnp.exp(logits) * logits_mask
    log_prob = logits - jnp.log(exp_logits.sum(1, keepdims=True) + 0.0001)
    mlpp = (mask * log_prob).sum(1) / (mask.sum(1) + 0.0001)
    loss = -(temperature / base_temperature) * mlpp
    return loss.mean()


if __name__ == "__main__":
    key = jax.random.PRNGKey(0)
    k1, k2, k3 = jax.random.split(key, 3)
    bsz, C, H, W = 2, 4, 16, 16
    features = jax.random.normal(k1, (bsz, C, H, W), jnp.float32)
    labels = jax.random.normal(k2, (bsz, C, H, W), jnp.float32)
    with_rain = jax.random.normal(k3, (bsz, C, H, W), jnp.float32)

    loss = supcon_loss(features, labels, with_rain)
    loss = jax.block_until_ready(loss)

    ref = _supcon_ref(features, labels, with_rain)
    assert jnp.allclose(loss, ref, rtol=1e-4, atol=1e-5), (loss, ref)
    print("KERNEL_OK")
</pallas_src>

<mosaic_0001>
module attributes {stable_mosaic.version = 11 : i64} {
  func.func @_supcon_kernel(%arg0: i32, %arg1: memref<6x512xf32, #tpu.memory_space<vmem>>, %arg2: memref<1x1xf32, #tpu.memory_space<vmem>>, %arg3: memref<6x6xf32, #tpu.memory_space<vmem>>, %arg4: memref<6x512xf32, #tpu.memory_space<vmem>>) attributes {dimension_semantics = [#tpu.dimension_semantics<arbitrary>], iteration_bounds = array<i64: 2>, scalar_prefetch = 0 : i64, scratch_operands = 2 : i64, tpu.core_type = #tpu.core_type<tc>, window_params = [{transform_indices = @transform_0, window_bounds = array<i64: 6, 512>}, {pipeline_mode = #tpu.pipeline_mode<synchronous>, transform_indices = @transform_1, window_bounds = array<i64: 1, 1>}]} {
    %c0_i32 = arith.constant 0 : i32
    %0 = arith.cmpi eq, %arg0, %c0_i32 : i32
    %1 = arith.extui %0 : i1 to i32
    %c0_i32_0 = arith.constant 0 : i32
    %2 = arith.cmpi ne, %1, %c0_i32_0 : i32
    scf.if %2 {
      %cst_16 = arith.constant 0.000000e+00 : f32
      %27 = vector.broadcast %cst_16 : f32 to vector<6x6xf32>
      %c0_17 = arith.constant 0 : index
      %c0_18 = arith.constant 0 : index
      %28 = vector.load %arg3[%c0_17, %c0_18] : memref<6x6xf32, #tpu.memory_space<vmem>>, vector<6x6xf32>
      tpu.vector_store %arg3[%c0_17, %c0_18], %27 {strides = array<i32>} : memref<6x6xf32, #tpu.memory_space<vmem>>, vector<6x6xf32>,
    } else {
    }
    %c0 = arith.constant 0 : index
    %c0_1 = arith.constant 0 : index
    %3 = vector.load %arg1[%c0, %c0_1] : memref<6x512xf32, #tpu.memory_space<vmem>>, vector<6x256xf32>
    %4 = arith.mulf %3, %3 : vector<6x256xf32>
    %cst = arith.constant dense<0.000000e+00> : vector<6xf32>
    %5 = vector.multi_reduction <add>, %4, %cst [1] : vector<6x256xf32> to vector<6xf32>
    %6 = vector.shape_cast %5 : vector<6xf32> to vector<6x1xf32>
    %7 = math.rsqrt %6 : vector<6x1xf32>
    %8 = vector.broadcast %7 : vector<6x1xf32> to vector<6x256xf32>
    %9 = arith.mulf %3, %8 : vector<6x256xf32>
    %c0_2 = arith.constant 0 : index
    %c0_3 = arith.constant 0 : index
    %10 = vector.load %arg4[%c0_2, %c0_3] : memref<6x512xf32, #tpu.memory_space<vmem>>, vector<6x256xf32>
    tpu.vector_store %arg4[%c0_2, %c0_3], %9 {strides = array<i32>} : memref<6x512xf32, #tpu.memory_space<vmem>>, vector<6x256xf32>,
    %c0_4 = arith.constant 0 : index
    %c256 = arith.constant 256 : index
    %11 = vector.load %arg1[%c0_4, %c256] : memref<6x512xf32, #tpu.memory_space<vmem>>, vector<6x256xf32>
    %12 = arith.mulf %11, %11 : vector<6x256xf32>
    %cst_5 = arith.constant dense<0.000000e+00> : vector<6xf32>
    %13 = vector.multi_reduction <add>, %12, %cst_5 [1] : vector<6x256xf32> to vector<6xf32>
    %14 = vector.shape_cast %13 : vector<6xf32> to vector<6x1xf32>
    %15 = math.rsqrt %14 : vector<6x1xf32>
    %16 = vector.broadcast %15 : vector<6x1xf32> to vector<6x256xf32>
    %17 = arith.mulf %11, %16 : vector<6x256xf32>
    %c0_6 = arith.constant 0 : index
    %c256_7 = arith.constant 256 : index
    %18 = vector.load %arg4[%c0_6, %c256_7] : memref<6x512xf32, #tpu.memory_space<vmem>>, vector<6x256xf32>
    tpu.vector_store %arg4[%c0_6, %c256_7], %17 {strides = array<i32>} : memref<6x512xf32, #tpu.memory_space<vmem>>, vector<6x256xf32>,
    %c0_8 = arith.constant 0 : index
    %c0_9 = arith.constant 0 : index
    %19 = vector.load %arg4[%c0_8, %c0_9] : memref<6x512xf32, #tpu.memory_space<vmem>>, vector<6x512xf32>
    %c0_10 = arith.constant 0 : index
    %c0_11 = arith.constant 0 : index
    %20 = vector.load %arg3[%c0_10, %c0_11] : memref<6x6xf32, #tpu.memory_space<vmem>>, vector<6x6xf32>
    %cst_12 = arith.constant dense<0.000000e+00> : vector<6x6xf32>
    %21 = tpu.matmul %19, %19, %cst_12 {dimension_numbers = #tpu.dot_dimension_numbers<[1], [1], [0], [0], [0, 0, 1, 0], [], []>} : vector<6x512xf32>, vector<6x512xf32>, vector<6x6xf32> -> vector<6x6xf32>
    %22 = arith.addf %20, %21 : vector<6x6xf32>
    %c0_13 = arith.constant 0 : index
    %c0_14 = arith.constant 0 : index
    %23 = vector.load %arg3[%c0_13, %c0_14] : memref<6x6xf32, #tpu.memory_space<vmem>>, vector<6x6xf32>
    tpu.vector_store %arg3[%c0_13, %c0_14], %22 {strides = array<i32>} : memref<6x6xf32, #tpu.memory_space<vmem>>, vector<6x6xf32>,
    %c1_i32 = arith.constant 1 : i32
    %24 = arith.cmpi eq, %arg0, %c1_i32 : i32
    %25 = arith.extui %24 : i1 to i32
    %c0_i32_15 = arith.constant 0 : i32
    %26 = arith.cmpi ne, %25, %c0_i32_15 : i32
    scf.if %26 {
      %c0_16 = arith.constant 0 : index
      %c0_17 = arith.constant 0 : index
      %27 = vector.load %arg3[%c0_16, %c0_17] : memref<6x6xf32, #tpu.memory_space<vmem>>, vector<6x6xf32>
      %cst_18 = arith.constant 14.2857141 : f32
      %28 = vector.broadcast %cst_18 : f32 to vector<6x6xf32>
      %29 = arith.mulf %27, %28 : vector<6x6xf32>
      %30 = tpu.iota {dimensions = array<i32: 0>} : vector<6x6xi32>
      %31 = tpu.iota {dimensions = array<i32: 1>} : vector<6x6xi32>
      %c4_i32 = arith.constant 4 : i32
      %32 = vector.broadcast %c4_i32 : i32 to vector<6x6xi32>
      %33 = arith.cmpi sge, %30, %32 : vector<6x6xi32>
      %c4_i32_19 = arith.constant 4 : i32
      %34 = vector.broadcast %c4_i32_19 : i32 to vector<6x6xi32>
      %35 = arith.cmpi sge, %31, %34 : vector<6x6xi32>
      %36 = arith.xori %33, %35 : vector<6x6xi1>
      %cst_20 = arith.constant dense<true> : vector<6x6xi1>
      %37 = arith.xori %36, %cst_20 : vector<6x6xi1>
      %38 = arith.cmpi ne, %30, %31 : vector<6x6xi32>
      %39 = arith.extui %38 : vector<6x6xi1> to vector<6x6xi32>
      %40 = arith.sitofp %39 : vector<6x6xi32> to vector<6x6xf32>
      %41 = arith.andi %37, %38 : vector<6x6xi1>
      %42 = arith.extui %41 : vector<6x6xi1> to vector<6x6xi32>
      %43 = arith.sitofp %42 : vector<6x6xi32> to vector<6x6xf32>
      %cst_21 = arith.constant dense<0xFF800000> : vector<6xf32>
      %44 = vector.multi_reduction <maximumf>, %29, %cst_21 [1] : vector<6x6xf32> to vector<6xf32>
      %45 = vector.shape_cast %44 : vector<6xf32> to vector<6x1xf32>
      %46 = vector.broadcast %45 : vector<6x1xf32> to vector<6x6xf32>
      %47 = arith.subf %29, %46 : vector<6x6xf32>
      %48 = math.exp %47 : vector<6x6xf32>
      %49 = arith.mulf %48, %40 : vector<6x6xf32>
      %cst_22 = arith.constant dense<0.000000e+00> : vector<6xf32>
      %50 = vector.multi_reduction <add>, %49, %cst_22 [1] : vector<6x6xf32> to vector<6xf32>
      %51 = vector.shape_cast %50 : vector<6xf32> to vector<6x1xf32>
      %cst_23 = arith.constant 9.99999974E-5 : f32
      %52 = vector.broadcast %cst_23 : f32 to vector<6x1xf32>
      %53 = arith.addf %51, %52 : vector<6x1xf32>
      %54 = math.log %53 : vector<6x1xf32>
      %55 = vector.broadcast %54 : vector<6x1xf32> to vector<6x6xf32>
      %56 = arith.subf %47, %55 : vector<6x6xf32>
      %57 = arith.mulf %43, %56 : vector<6x6xf32>
      %cst_24 = arith.constant dense<0.000000e+00> : vector<6xf32>
      %58 = vector.multi_reduction <add>, %57, %cst_24 [1] : vector<6x6xf32> to vector<6xf32>
      %59 = vector.shape_cast %58 : vector<6xf32> to vector<6x1xf32>
      %cst_25 = arith.constant dense<0.000000e+00> : vector<6xf32>
      %60 = vector.multi_reduction <add>, %43, %cst_25 [1] : vector<6x6xf32> to vector<6xf32>
      %61 = vector.shape_cast %60 : vector<6xf32> to vector<6x1xf32>
      %cst_26 = arith.constant 9.99999974E-5 : f32
      %62 = vector.broadcast %cst_26 : f32 to vector<6x1xf32>
      %63 = arith.addf %61, %62 : vector<6x1xf32>
      %64 = tpu.reciprocal %63 : vector<6x1xf32> -> vector<6x1xf32>
      %65 = arith.mulf %59, %64 : vector<6x1xf32>
      %cst_27 = arith.constant -1.000000e+00 : f32
      %66 = vector.broadcast %cst_27 : f32 to vector<6x1xf32>
      %67 = arith.mulf %66, %65 : vector<6x1xf32>
      %cst_28 = arith.constant dense<0.000000e+00> : vector<1xf32>
      %68 = vector.multi_reduction <add>, %67, %cst_28 [0] : vector<6x1xf32> to vector<1xf32>
      %69 = vector.shape_cast %68 : vector<1xf32> to vector<1x1xf32>
      %cst_29 = arith.constant 0.166666672 : f32
      %70 = vector.broadcast %cst_29 : f32 to vector<1x1xf32>
      %71 = arith.mulf %69, %70 : vector<1x1xf32>
      %c0_30 = arith.constant 0 : index
      %c0_31 = arith.constant 0 : index
      %72 = vector.load %arg2[%c0_30, %c0_31] : memref<1x1xf32, #tpu.memory_space<vmem>>, vector<1x1xf32>
      tpu.vector_store %arg2[%c0_30, %c0_31], %71 {strides = array<i32>} : memref<1x1xf32, #tpu.memory_space<vmem>>, vector<1x1xf32>,
    } else {
    }
    return
  }
  func.func @transform_0(%arg0: i32) -> (i32, i32) {
    %c0_i32 = arith.constant 0 : i32
    %c0_i32_0 = arith.constant 0 : i32
    return %c0_i32, %arg0 : i32, i32
  }
  func.func @transform_1(%arg0: i32) -> (i32, i32) {
    %c0_i32 = arith.constant 0 : i32
    %c0_i32_0 = arith.constant 0 : i32
    %c0_i32_1 = arith.constant 0 : i32
    return %c0_i32, %c0_i32_0 : i32, i32
  }
}

</mosaic_0001>

<bundles_post_ra>
// kernel: tpu_custom_call.1
= control target key start
LH: loop header
LB: loop body
LE: loop exit
PB: predicated region body
PF: predicated region fallthrough
CT: control target
= control target key end

     0   :  { %6 = vsyncpa [#allocation5], 0  ;;  %s741_s0 = inlined_call_operand.hbm [shape: f32[6,1024], index: 0, kind: input, shape index: {}]   ;;  %s742_s1 = inlined_call_operand.hbm [shape: f32[1,1], index: 1, kind: output, shape index: {}]  }
   0x1   :  { %8 = vsyncpa [#allocation5 + $0x1], 0 }
   0x2   :  { %9 = vsyncpa [#allocation6], 0  ;;  %s604_s6 = smov 0   ;;  %s606_s7 = smov 0  }
   0x3   :  { %s608_s8 = smov 0   ;;  %s610_s9 = smov 0  }
   0x4 LB: > { %s623_s10 = sadd.s32 4294967295, %s587_s9   ;;  %s626_s11 = sadd.s32 1, %s587_s9   ;;  %s587_s9 = sphi %s610_s9, %s750_s9   ;;  %s583_s8 = sphi %s608_s8, %s749_s8   ;;  %s579_s7 = sphi %s606_s7, %s748_s7   ;;  %s575_s6 = sphi %s604_s6, %s747_s6  }
   0x5   : > { %s19_s12 = ssub.s32 %s587_s9, %s626_s11  ;;  %s22_s13 = sadd.s32 1, %s583_s8 }
   0x6   : > { %p20_p0 = scmp.eq.s32.totalorder %s19_s12, 0  ;;  %p29_p1 = scmp.ne.s32.totalorder %s583_s8, %s579_s7 }
   0x7   : > { %p30_p2 = scmp.eq.s32.totalorder %s587_s9, 0  ;;  %p35_p3 = scmp.ne.s32.totalorder %s579_s7, %s575_s6 }
   0x8   : > { %s636_s14 = scalar_select %p20_p0, %s583_s8, %s22_s13  }
   0x9   : > { %p31_p4 = por %p30_p2, %p29_p1  ;;  %p36_p5 = scmp.eq.s32.totalorder %s623_s10, 0 }
   0xa   : > { %p444_p6 = scmp.lt.s32.totalorder %s587_s9, 2  ;;  %s80_s16 = sand.u32 1, %s583_s8  }
   0xb   : > { %p640_p7 = por %p36_p5, %p35_p3  ;;  %s420_s17 = sshll.u32 %s80_s16, 5 }
   0xc   : > { %s433_s18 = sshll.u32 %s587_s9, 9  ;;  %s84_s22 = scalar_lea.vmem [#allocation4], %s420_s17 }
   0xd   : > { %s649_s21 = scalar_lea.hbm %s741_s0, %s433_s18  ;;  %s92_s23 = sshll.u32 %s84_s22, 4  ;;  %s651_s23 = int_to_ptr.vmem [resolvable:$true] %s92_s23 }
   0xe   : > { %p653_p8 = pnand %p444_p6, %p31_p4  ;;  %s81_s25 = scalar_lea.sflag [#allocation5], %s80_s16 }
   0xf   : > { %s493_s26 = scalar_lea.hbm %s649_s21, 512  ;;  %s498_s29 = scalar_lea.hbm %s741_s0, 1024 }
  0x10   : > { %p494_p11 = scmp.ne.s32.totalorder %s649_s21, %s493_s26  ;;  %p495_p12 = pneg %p653_p8 }
  0x11   : > { %p499_p1 = scmp.lt.u32.totalorder %s649_s21, %s741_s0  ;;  %p500_p2 = scmp.lt.u32.totalorder %s498_s29, %s493_s26 }
  0x12   : > { %p496_p13 = pnand %p495_p12, %p494_p11  ;;  %p502_p4 = scmp.lt.u32.totalorder %s493_s26, %s649_s21 }
  0x13   : > { %p501_p3 = por %p500_p2, %p499_p1 }
  0x14   : > { %p497_p0 = pneg %p496_p13 }
  0x15   : > { %p503_p5 = por %p502_p4, %p501_p3 }
  0x17   : > { %p504_p6 = pnand %p503_p5, %p497_p0 }
  0x19   : > { %507 = shalt.err (!%p504_p6)
}
  0x1a   : > { %s508_s3 = scalar_lea.vmem %s651_s23, 512  ;;  %s589_s4 = smov [#allocation4]  }
  0x1b   : > { %p509_p11 = scmp.ne.s32.totalorder %s651_s23, %s508_s3  ;;  %s513_s5 = sshll.u32 %s589_s4, 4  ;;  %s514_s5 = int_to_ptr.vmem [resolvable:$false] %s513_s5 }
  0x1c   : > { %s515_s6 = scalar_lea.vmem %s514_s5, 1024  ;;  %p516_p10 = scmp.lt.s32.totalorder %s651_s23, %s514_s5 }
  0x1d   : > { %p511_p13 = pnand %p509_p11, %p495_p12  ;;  %p517_p1 = scmp.lt.s32.totalorder %s515_s6, %s508_s3 }
  0x1f   : > { %p512_p9 = pneg %p511_p13  ;;  %p518_p2 = por %p517_p1, %p516_p10 }
  0x21   : > { %p519_p3 = pnand %p518_p2, %p512_p9 }
  0x23   : > { %522 = shalt.err (!%p519_p3)
}
  0x24   : > { %443 = dma.hbm_to_vmem [thread:$0]  (!%p653_p8), %s649_s21, 512, %s651_s23, %s81_s25  }
  0x25   : > { %p745_p0 = scmp.lt.s32.totalorder %s587_s9, 3  ;;  %p746_p4 = scmp.ge.s32.totalorder %s587_s9, 1 }
  0x27   : > { %p98_p12 = pnand %p746_p4, %p745_p0 }
  0x28   : > { %s103_s12 = sand.u32 (!%p98_p12), 1, %s579_s7  }
  0x29   : > { %101 = sbr.rel (%p98_p12) target bundleno = 971 (0x3cb), region = 24  ;;  %s424_s13 = sshll.u32 (!%p98_p12), %s103_s12, 5 }
  0x2a   : > { %s104_s16 = scalar_lea.sflag (!%p98_p12), [#allocation5], %s103_s12  ;;  %s107_s17 = scalar_lea.vmem (!%p98_p12), [#allocation4], %s424_s13 }
  0x30   : > { %566 = dma.done.wait (%p640_p7), %s104_s16, 512  }
  0x31   : > { %568 = vsyncadd (%p640_p7), %s104_s16, 4294966784  ;;  %p425_p9 = scmp.ne.s32.totalorder %s623_s10, 0 }
  0x32   : > { %vm126_vm0 = vcmask (!%p425_p9), 46080   ;;  %v590_v0 = vmov (!%p425_p9), 0.0  }
  0x33   : > { %125 = sbr.rel (%p425_p9) target bundleno = 58 (0x3a), region = 32  ;;  %127 = vst.msk [vmem:[#allocation2] sm:$0x3f] (!%p425_p9), %vm126_vm0, %v590_v0 }
  0x3a PF: > { %v128_v1 = vld [vmem:[%s107_s17] sm:$0x3f]  ;;  %v129_v2 = vld [vmem:[%s107_s17 + $0x8] sm:$0x3f]  ;;  %vm132_vm1 = vcmask 1045504   ;;  %vm303_vm2 = vcmask 46080  }
  0x3b   : > { %v130_v3 = vmul.f32 %v128_v1, %v128_v1  ;;  %v131_v4 = vmul.f32 %v129_v2, %v129_v2  ;;  %v143_v5 = vld [vmem:[%s107_s17 + $0x10] sm:$0x3f]  ;;  %v144_v6 = vld [vmem:[%s107_s17 + $0x18] sm:$0x3f]  ;;  %p426_p7 = scmp.ne.s32.totalorder %s623_s10, 1 }
  0x3c   : > { %v145_v7 = vmul.f32 %v143_v5, %v143_v5  ;;  %v146_v8 = vmul.f32 %v144_v6, %v144_v6  ;;  %v161_v29 = vld [vmem:[#allocation2] sm:$0x3f]  ;;  %v311_v39 = vlaneseq (!%p426_p7)  ;;  %v591_v43 = vmov (!%p426_p7), 0.0  }
  0x3d   : > { %v133_v9 = vsel %vm132_vm1, %v130_v3, 0.0  ;;  %v134_v10 = vsel %vm132_vm1, %v131_v4, 0.0  ;;  %vm592_vm7 = vmmov (!%p426_p7), 1   ;;  %vm358_vm10 = vcmask (!%p426_p7), 0  }
  0x3e   : > { %v135_v11 = vadd.f32 %v134_v10, %v133_v9  ;;  %v147_v12 = vsel %vm132_vm1, %v145_v7, 0.0  ;;  %v148_v13 = vsel %vm132_vm1, %v146_v8, 0.0  ;;  %v312_v41 = vshrl.u32 (!%p426_p7), %v311_v39, 7 }
  0x3f   : > { %v149_v14 = vadd.f32 %v148_v13, %v147_v12  ;;  %v314_v42 = vand.u32 (!%p426_p7), 127, %v311_v39 }
  0x40   : > { %136 = vadd.xlane.f32.xlu0 %v135_v11  ;;  %vm315_vm4 = vcmp.ge.s32.totalorder (!%p426_p7), %v312_v41, 4 }
  0x41   : > { %vm319_vm3 = vcmp.ne.s32.totalorder (!%p426_p7), %v312_v41, %v314_v42  ;;  %vm316_vm5 = vcmp.ge.s32.totalorder (!%p426_p7), %v314_v42, 4 }
  0x42   : > { %v427_v44 = vsel (!%p426_p7), %vm319_vm3, 1.0, %v591_v43  ;;  %vm317_vm6 = vmxor (!%p426_p7), %vm315_vm4, %vm316_vm5 }
  0x43   : > { %vm318_vm8 = vmxor (!%p426_p7), %vm317_vm6, %vm592_vm7 }
  0x44   : > { %150 = vadd.xlane.f32.xlu0 %v149_v14  ;;  %vm322_vm9 = vmand (!%p426_p7), %vm318_vm8, %vm319_vm3 }
  0x45   : > { %v428_v48 = vsel (!%p426_p7), %vm322_vm9, 1.0, %v591_v43 }
  0x46   : > { %v343_v49 = vsel (!%p426_p7), %vm303_vm2, %v428_v48, 0.0 }
  0x47   : > { %344 = vadd.xlane.f32.xlu1 (!%p426_p7), %v343_v49 }
  0xcd   : > { %v137_v15 = vpop.xlane.xlu0 %136 }
  0xce   : > { %483 = vrsqrt.f32 %v137_v15 }
  0xd1   : > { %v151_v16 = vpop.xlane.xlu0 %150 }
  0xd2   : > { %485 = vrsqrt.f32 %v151_v16 }
  0xd4   : > { %v345_v57 = vpop.xlane.xlu1 (!%p426_p7), %344 }
  0xd5   : > { %v346_v58 = vadd.f32 (!%p426_p7), 0.0001, %v345_v57 }
  0xd8   : > { %v484_v17 = vpop.eup %483 }
  0xd9   : > { %v139_v18 = vmul.f32 %v484_v17, %v128_v1  ;;  %v140_v19 = vmul.f32 %v484_v17, %v129_v2 }
  0xdb   : > { %141 = vst [vmem:[#allocation3] sm:$0x3f] %v139_v18  ;;  %142 = vst [vmem:[#allocation3 + $0x8] sm:$0x3f] %v140_v19 }
  0xdc   : > { %v486_v20 = vpop.eup %485 }
  0xdd   : > { %v153_v21 = vmul.f32 %v486_v20, %v143_v5  ;;  %v154_v22 = vmul.f32 %v486_v20, %v144_v6 }
  0xdf   : > { %155 = vst [vmem:[#allocation3 + $0x10] sm:$0x3f] %v153_v21  ;;  %156 = vst [vmem:[#allocation3 + $0x18] sm:$0x3f] %v154_v22 }
  0xe2   : > { %v158_v23 = vld [vmem:[#allocation3 + $0x8] sm:$0x3f]  ;;  %v157_v24 = vld [vmem:[#allocation3] sm:$0x3f] }
  0xe3   : > { %162 = vmatprep.subr.mxu0 %v158_v23  ;;  %226 = vmatprep.mubr.f32.mxu0 %v158_v23 }
  0xe4   : > { %163 = vmatpush1.xpose.msra.mxu0 %v157_v24 }
  0xe6   : > { %v160_v25 = vld [vmem:[#allocation3 + $0x18] sm:$0x3f]  ;;  %v159_v26 = vld [vmem:[#allocation3 + $0x10] sm:$0x3f] }
  0xe7   : > { %227 = vmatmul.mubr.f32.vlgmr.msra.gmra.mrb[0].mxu0 %v157_v24  ;;  %232 = vmatprep.subr.mxu1 %v160_v25 }
  0xe8   : > { %296 = vmatprep.mubr.f32.mxu1 %v160_v25  ;;  %233 = vmatpush1.xpose.msra.mxu1 %v159_v26 }
  0xeb   : > { %297 = vmatmul.mubr.f32.vlgmr.msra.gmra.mrb[0].mxu1 %v159_v26 }
 0x1ba   : > { %v228_v27 = vpop.f32.mrb[0].mxu0 }
 0x1bb   : > { %v230_v28 = vpop.f32.mrb[1].mxu0 }
 0x1bd   : > { %308 = sbr.rel (%p426_p7) target bundleno = 946 (0x3b2), region = 36 }
 0x1be   : > { %v298_v30 = vpop.f32.mrb[0].mxu1 }
 0x1bf   : > { %v299_v31 = vadd.f32 %v298_v30, %v228_v27  ;;  %v300_v32 = vpop.f32.mrb[1].mxu1 }
 0x1c1   : > { %v302_v33 = vadd.f32 %v299_v31, %v161_v29 }
 0x1c3   : > { %304 = vst.msk [vmem:[#allocation2] sm:$0x3f] %vm303_vm2, %v302_v33 }
 0x1ca   : > { %v309_v34 = vld [vmem:[#allocation2] sm:$0x3f] }
 0x1cb   : > { %v310_v35 = vmul.f32 14.285714, %v309_v34 }
 0x1cd   : > { %v325_v36 = vsel %vm303_vm2, %v310_v35, -inf }
 0x1ce   : > { %326 = vmax.xlane.f32.xlu0 %v325_v36 }
 0x25b   : > { %v327_v37 = vpop.xlane.xlu0 %326 }
 0x25c   : > { %v328_v38 = vsub.f32 %v310_v35, %v327_v37 }
 0x25e   : > { %v329_v40 = vmul.f32 1.442695, %v328_v38 }
 0x260   : > { %487 = vpow2.f32 %v329_v40 }
 0x26a   : > { %v488_v45 = vpop.eup %487 }
 0x26b   : > { %v331_v46 = vmul.f32 %v488_v45, %v427_v44 }
 0x26d   : > { %v332_v47 = vsel %vm303_vm2, %v331_v46, 0.0 }
 0x26e   : > { %333 = vadd.xlane.f32.xlu0 %v332_v47 }
 0x2fb   : > { %v334_v50 = vpop.xlane.xlu0 %333 }
 0x2fc   : > { %v335_v51 = vadd.f32 0.0001, %v334_v50 }
 0x2fe   : > { %489 = vlog2.f32 %v335_v51 }
 0x2ff   : > { %491 = vrcp.f32 %v346_v58 }
 0x308   : > { %v490_v52 = vpop.eup %489 }
 0x309   : > { %v337_v53 = vmul.f32 0.6931472, %v490_v52  ;;  %v492_v59 = vpop.eup %491 }
 0x30b   : > { %v338_v54 = vsub.f32 %v328_v38, %v337_v53 }
 0x30d   : > { %v339_v55 = vmul.f32 %v428_v48, %v338_v54 }
 0x30f   : > { %v340_v56 = vsel %vm303_vm2, %v339_v55, 0.0 }
 0x310   : > { %341 = vadd.xlane.f32.xlu1 %v340_v56 }
 0x39d   : > { %v342_v60 = vpop.xlane.xlu1 %341 }
 0x39e   : > { %v348_v61 = vmul.f32 %v492_v59, %v342_v60 }
 0x3a0   : > { %v349_v62 = vmul.f32 -1.0, %v348_v61 }
 0x3a2   : > { %v350_v63 = vsel %vm132_vm1, %v349_v62, 0.0 }
 0x3a3   : > { %v351_v0 = vrot.slane %v350_v63, 4 }
 0x3a5   : > { %v352_v1 = vadd.f32 %v351_v0, %v350_v63 }
 0x3a7   : > { %v353_v2 = vrot.slane %v352_v1, 2 }
 0x3a9   : > { %v354_v3 = vadd.f32 %v353_v2, %v352_v1 }
 0x3ab   : > { %v355_v4 = vrot.slane %v354_v3, 1 }
 0x3ad   : > { %v356_v5 = vadd.f32 %v355_v4, %v354_v3 }
 0x3af   : > { %v357_v6 = vmul.f32 0.16666667, %v356_v5 }
 0x3b1   : > { %359 = vst.msk [vmem:[#allocation7] sm:$0x1] %vm358_vm10, %v357_v6 }
 0x3b2 PF: > { %p445_p8 = scmp.eq.s32.totalorder %s623_s10, 1  ;;  %s593_s9 = smov [#allocation7]  }
 0x3b3   : > { %s367_s15 = sshll.u32 %s593_s9, 4  ;;  %s368_s15 = int_to_ptr.vmem [resolvable:$true] %s367_s15 }
 0x3b4   : > { %s523_s18 = scalar_lea.vmem %s368_s15, 16  ;;  %s529_s19 = scalar_lea.vmem %s368_s15, 32 }
 0x3b5   : > { %p524_p10 = scmp.ne.s32.totalorder %s368_s15, %s523_s18  ;;  %p530_p11 = scmp.lt.s32.totalorder %s368_s15, %s368_s15 }
 0x3b6   : > { %p531_p13 = scmp.lt.s32.totalorder %s529_s19, %s523_s18 }
 0x3b7   : > { %p525_p5 = pnand %p524_p10, %p445_p8 }
 0x3b8   : > { %p532_p1 = por %p531_p13, %p530_p11 }
 0x3b9   : > { %p526_p6 = pneg %p525_p5 }
 0x3bb   : > { %p533_p2 = pnand %p532_p1, %p526_p6 }
 0x3bd   : > { %536 = shalt.err (!%p533_p2)
}
 0x3be   : > { %s537_s22 = scalar_lea.hbm %s742_s1, 16 }
 0x3bf   : > { %p538_p3 = scmp.ne.s32.totalorder %s742_s1, %s537_s22  ;;  %p543_p12 = scmp.lt.u32.totalorder %s537_s22, %s742_s1 }
 0x3c1   : > { %p539_p0 = pnand %p538_p3, %p445_p8 }
 0x3c3   : > { %p540_p4 = pneg %p539_p0 }
 0x3c5   : > { %p545_p9 = pnand %p543_p12, %p540_p4 }
 0x3c7   : > { %548 = shalt.err (!%p545_p9)
}
 0x3c8   : > { %437 = dma.vmem_to_hbm [thread:$0]  (%p445_p8), %s368_s15, 16, %s742_s1, [#allocation6]  }
 0x3c9   : > { %570 = dma.done.wait (%p445_p8), [#allocation6], 16  }
 0x3ca   : > { %572 = vsyncadd (%p445_p8), [#allocation6], 4294967280 }
 0x3cb PF: > { %p12_p7 = scmp.ge.s32.totalorder %s626_s11, 4   ;;  %s747_s6 = smov %s579_s7 }
 0x3cc   : > { %s748_s7 = smov %s583_s8  ;;  %s749_s8 = smov %s636_s14 }
 0x3cd   : > { %s750_s9 = smov %s626_s11  ;;  %14 = sbr.rel (!%p12_p7) target bundleno = 4 (0x4), region = 69 }
 0x3d4   :  { %380 = vsyncpa [#allocation5], 1 }
 0x3d5   :  { %382 = vsyncpa [#allocation5 + $0x1], 1 }
 0x3d6   :  { %383 = vsyncpa [#allocation6], 1 }
 0x3d7   :  { %385 = vsyncpa [#allocation6 + $0x1], 1 }

</bundles_post_ra>
